<compile_context>
chip_gen: v6e
topology: v6e:2x2x1
jax: 0.10.0
libtpu: 0.0.40
codegen_flags: <defaults>
</compile_context>

<pallas_src>
import functools

import jax
import jax.numpy as jnp
from jax.experimental import pallas as pl
from jax.experimental.pallas import tpu as pltpu

LANE = 128


def _round_up(n, m):
    return ((n + m - 1) // m) * m


def _mlp_kernel(n_hidden, x_ref, *refs):
    """Fused MLP forward for one batch tile.

    refs = (w0, b0, ..., w_{n_hidden-1}, b_{n_hidden-1},
            w_last_rep, b_last_smem, out_ref)

    * x_ref:       f32 (TB, d_in)               (cast to bf16 in-kernel)
    * hidden w_i:  bf16 (in_pad_i, hid_pad_i)   (zero-padded)
    * hidden b_i:  f32  (1, hid_pad_i)
    * w_last_rep:  bf16 (8, h_last_pad)         (final weight row replicated x8)
    * b_last_smem: f32  (1,) in SMEM
    * out_ref:     f32  (1, TB)                 (lane-packed probabilities)
    """
    out_ref = refs[-1]
    params = refs[:-1]

    h = x_ref[...].astype(jnp.bfloat16)  # in-kernel cast, (TB, d_in)
    for i in range(n_hidden):
        w = params[2 * i][...]        # bf16 (in_pad, hid_pad) -> MXU, f32 accumulate
        b = params[2 * i + 1][...]    # f32  (1, hid_pad)
        z = jnp.dot(h, w, preferred_element_type=jnp.float32) + b
        h = jnp.maximum(z, 0.0).astype(jnp.bfloat16)  # ReLU, back to bf16

    # Final Linear(..., 1): w_row @ h^T on the MXU so the result is already
    # lane-major (batch on lanes).  w_last_rep has the weight row replicated
    # across 8 sublanes; all result rows are identical, keep row 0.
    w_last = params[2 * n_hidden][...]          # bf16 (8, h_last_pad)
    b_last = params[2 * n_hidden + 1][0]        # f32 scalar from SMEM
    z_last = jax.lax.dot_general(
        w_last, h, (((1,), (1,)), ((), ())),
        preferred_element_type=jnp.float32)     # (8, TB)
    out_ref[...] = jax.nn.sigmoid(z_last[0:1, :] + b_last)


def _vmem_estimate(TB, d_in, hid_dims):
    """Approximate VMEM footprint (bytes) for one config, double-buffered."""
    widths = [d_in] + [_round_up(h, LANE) for h in hid_dims]
    total = 0
    total += 2 * TB * _round_up(d_in, LANE) * 4          # x tiles (f32)
    total += 2 * (TB // LANE) * 8 * LANE * 4             # (1, TB) f32 output tiles
    for i in range(len(hid_dims)):
        rows, cols = widths[i], widths[i + 1]
        total += 2 * _round_up(rows, 16) * cols * 2      # bf16 weight
        total += 2 * 8 * cols * 4                        # (1, cols) f32 bias (tile-padded)
    total += 2 * 16 * widths[-1] * 2                     # (8, h_last_pad) bf16 final weight
    wmax = max(widths + [LANE])
    total += 2 * TB * wmax * 6                           # f32 z + bf16 h temporaries, with margin
    return total + (1 << 20)


def domain_specific_predictor(x, weights, biases, *, block_batch=1024):
    """Run the fused MLP Pallas kernel.

    x:       (B, d_in) float32
    weights: list of (in_i, out_i) float32 arrays (last out = 1)
    biases:  list of (out_i,) float32 arrays
    returns: (B, 1) float32 in (0, 1)
    """
    B, d_in = x.shape
    n_layers = len(weights)
    assert n_layers >= 1 and weights[-1].shape[1] == 1
    n_hidden = n_layers - 1
    hid_dims = [weights[i].shape[1] for i in range(n_hidden)]

    # ---- batch tiling: >=2 grid steps when B allows (v7x dual-TC), VMEM-capped ----
    TB = min(block_batch, _round_up(max(pl.cdiv(B, 2), 1), LANE))
    TB = max(TB, LANE)
    while TB > LANE and _vmem_estimate(TB, d_in, hid_dims) > (40 << 20):
        TB = max(LANE, _round_up(TB // 2, LANE))
    B_pad = _round_up(B, TB)
    vmem_limit = int(min(48 << 20,
                         max(16 << 20, 2 * _vmem_estimate(TB, d_in, hid_dims))))

    # ---- x: batch-only padding, stays f32 (bf16 cast happens in-kernel) ----
    if B_pad == B:
        x_p = x
    else:
        x_p = jnp.zeros((B_pad, d_in), x.dtype).at[:B].set(x)

    # ---- hidden layers: bf16 weights (in_pad, hid_pad), f32 biases (1, hid_pad) ----
    act_widths = [d_in] + [_round_up(h, LANE) for h in hid_dims]
    flat = []
    for i in range(n_hidden):
        w, b = weights[i], biases[i]
        rows, cols = act_widths[i], _round_up(w.shape[1], LANE)
        wp = jnp.zeros((rows, cols), jnp.bfloat16)
        wp = wp.at[: w.shape[0], : w.shape[1]].set(w.astype(jnp.bfloat16))
        bp = jnp.zeros((1, cols), jnp.float32)
        bp = bp.at[0, : b.shape[0]].set(b.astype(jnp.float32))
        flat += [wp, bp]

    # ---- final layer: bf16 row replicated across 8 sublanes; scalar bias to SMEM ----
    w_last, b_last = weights[-1], biases[-1]
    last_rows = act_widths[-1]
    w_last_rep = jnp.zeros((8, last_rows), jnp.bfloat16)
    w_last_rep = w_last_rep.at[:, : w_last.shape[0]].set(
        jnp.broadcast_to(w_last[:, 0].astype(jnp.bfloat16), (8, w_last.shape[0])))
    b_last_smem = jnp.asarray(b_last, jnp.float32).reshape(1)
    flat += [w_last_rep]

    # ---- specs ----
    grid = (B_pad // TB,)
    x_spec = pl.BlockSpec((TB, d_in), lambda i: (i, 0))
    # Full-array blocks with constant index maps: params stay VMEM-resident.
    param_specs = [pl.BlockSpec(p.shape, lambda i: (0, 0)) for p in flat]
    smem_spec = pl.BlockSpec(memory_space=pltpu.MemorySpace.SMEM)
    out_spec = pl.BlockSpec((1, TB), lambda i: (0, i))

    kernel = functools.partial(_mlp_kernel, n_hidden)

    out_packed = pl.pallas_call(
        kernel,
        out_shape=jax.ShapeDtypeStruct((1, B_pad), jnp.float32),
        grid=grid,
        in_specs=[x_spec] + param_specs + [smem_spec],
        out_specs=out_spec,
        compiler_params=pltpu.CompilerParams(
            dimension_semantics=("parallel",),
            vmem_limit_bytes=vmem_limit,
        ),
    )(x_p, *flat, b_last_smem)

    return out_packed[0, :B].reshape(B, 1)


def init_params(key, d_in, hidden_dims):
    """Deterministic init mimicking PyTorch nn.Linear default (uniform +/- 1/sqrt(fan_in))."""
    dims = [d_in] + list(hidden_dims) + [1]
    weights, biases = [], []
    for i in range(len(dims) - 1):
        fan_in, fan_out = dims[i], dims[i + 1]
        key, kw, kb = jax.random.split(key, 3)
        bound = 1.0 / jnp.sqrt(jnp.float32(fan_in))
        # Stored as (in, out): equals PyTorch weight (out, in) transposed.
        w = jax.random.uniform(kw, (fan_in, fan_out), jnp.float32, -bound, bound)
        b = jax.random.uniform(kb, (fan_out,), jnp.float32, -bound, bound)
        weights.append(w)
        biases.append(b)
    return weights, biases


if __name__ == "__main__":
    key = jax.random.PRNGKey(0)

    batch = 8
    d_in = 32
    hidden_dims = [32, 16]

    key, kx = jax.random.split(key)
    x = jax.random.normal(kx, (batch, d_in), jnp.float32)

    weights, biases = init_params(key, d_in, hidden_dims)

    out = domain_specific_predictor(x, weights, biases)
    out = jax.block_until_ready(out)

    # Reference in plain JAX with the same dtype policy as the kernel
    # (bf16 inputs / weights / hidden activations, f32 accumulation,
    #  f32 bias + ReLU + sigmoid).
    h = x.astype(jnp.bfloat16)
    for i in range(len(weights) - 1):
        w = weights[i].astype(jnp.bfloat16)
        z = jnp.dot(h, w, preferred_element_type=jnp.float32) + biases[i]
        h = jnp.maximum(z, 0.0).astype(jnp.bfloat16)
    logits = jnp.dot(h, weights[-1].astype(jnp.bfloat16),
                     preferred_element_type=jnp.float32) + biases[-1]
    ref = jax.nn.sigmoid(logits)

    assert out.shape == (batch, 1)
    assert jnp.allclose(out, ref, atol=2e-3, rtol=0), (
        float(jnp.max(jnp.abs(out - ref)))
    )
    print("KERNEL_OK")
</pallas_src>

<mosaic_0001>
module attributes {stable_mosaic.version = 11 : i64} {
  func.func @_mlp_kernel(%arg0: i32, %arg1: memref<128x32xf32, #tpu.memory_space<vmem>>, %arg2: memref<32x128xbf16, #tpu.memory_space<vmem>>, %arg3: memref<1x128xf32, #tpu.memory_space<vmem>>, %arg4: memref<128x128xbf16, #tpu.memory_space<vmem>>, %arg5: memref<1x128xf32, #tpu.memory_space<vmem>>, %arg6: memref<8x128xbf16, #tpu.memory_space<vmem>>, %arg7: memref<1xf32, #tpu.memory_space<smem>>, %arg8: memref<1x128xf32, #tpu.memory_space<vmem>>) attributes {dimension_semantics = [#tpu.dimension_semantics<parallel>], iteration_bounds = array<i64: 1>, scalar_prefetch = 0 : i64, scratch_operands = 0 : i64, tpu.core_type = #tpu.core_type<tc>, window_params = [{transform_indices = @transform_0, window_bounds = array<i64: 128, 32>}, {pipeline_mode = #tpu.pipeline_mode<synchronous>, transform_indices = @transform_1, window_bounds = array<i64: 32, 128>}, {pipeline_mode = #tpu.pipeline_mode<synchronous>, transform_indices = @transform_2, window_bounds = array<i64: 1, 128>}, {pipeline_mode = #tpu.pipeline_mode<synchronous>, transform_indices = @transform_3, window_bounds = array<i64: 128, 128>}, {pipeline_mode = #tpu.pipeline_mode<synchronous>, transform_indices = @transform_4, window_bounds = array<i64: 1, 128>}, {pipeline_mode = #tpu.pipeline_mode<synchronous>, transform_indices = @transform_5, window_bounds = array<i64: 8, 128>}, {transform_indices = @transform_6, window_bounds = array<i64: 1>}, {transform_indices = @transform_7, window_bounds = array<i64: 1, 128>}]} {
    %c0 = arith.constant 0 : index
    %c0_0 = arith.constant 0 : index
    %0 = vector.load %arg1[%c0, %c0_0] : memref<128x32xf32, #tpu.memory_space<vmem>>, vector<128x32xf32>
    %1 = arith.truncf %0 : vector<128x32xf32> to vector<128x32xbf16>
    %c0_1 = arith.constant 0 : index
    %c0_2 = arith.constant 0 : index
    %2 = vector.load %arg2[%c0_1, %c0_2] : memref<32x128xbf16, #tpu.memory_space<vmem>>, vector<32x128xbf16>
    %c0_3 = arith.constant 0 : index
    %c0_4 = arith.constant 0 : index
    %3 = vector.load %arg3[%c0_3, %c0_4] : memref<1x128xf32, #tpu.memory_space<vmem>>, vector<1x128xf32>
    %cst = arith.constant dense<0.000000e+00> : vector<128x128xf32>
    %4 = tpu.matmul %1, %2, %cst {dimension_numbers = #tpu.dot_dimension_numbers<[1], [0], [0], [1], [0, 0, 1, 1], [], []>} : vector<128x32xbf16>, vector<32x128xbf16>, vector<128x128xf32> -> vector<128x128xf32>
    %5 = vector.broadcast %3 : vector<1x128xf32> to vector<128x128xf32>
    %6 = arith.addf %4, %5 : vector<128x128xf32>
    %cst_5 = arith.constant 0.000000e+00 : f32
    %7 = vector.broadcast %cst_5 : f32 to vector<128x128xf32>
    %8 = arith.maximumf %6, %7 : vector<128x128xf32>
    %9 = arith.truncf %8 : vector<128x128xf32> to vector<128x128xbf16>
    %c0_6 = arith.constant 0 : index
    %c0_7 = arith.constant 0 : index
    %10 = vector.load %arg4[%c0_6, %c0_7] : memref<128x128xbf16, #tpu.memory_space<vmem>>, vector<128x128xbf16>
    %c0_8 = arith.constant 0 : index
    %c0_9 = arith.constant 0 : index
    %11 = vector.load %arg5[%c0_8, %c0_9] : memref<1x128xf32, #tpu.memory_space<vmem>>, vector<1x128xf32>
    %cst_10 = arith.constant dense<0.000000e+00> : vector<128x128xf32>
    %12 = tpu.matmul %9, %10, %cst_10 {dimension_numbers = #tpu.dot_dimension_numbers<[1], [0], [0], [1], [0, 0, 1, 1], [], []>} : vector<128x128xbf16>, vector<128x128xbf16>, vector<128x128xf32> -> vector<128x128xf32>
    %13 = vector.broadcast %11 : vector<1x128xf32> to vector<128x128xf32>
    %14 = arith.addf %12, %13 : vector<128x128xf32>
    %cst_11 = arith.constant 0.000000e+00 : f32
    %15 = vector.broadcast %cst_11 : f32 to vector<128x128xf32>
    %16 = arith.maximumf %14, %15 : vector<128x128xf32>
    %17 = arith.truncf %16 : vector<128x128xf32> to vector<128x128xbf16>
    %c0_12 = arith.constant 0 : index
    %c0_13 = arith.constant 0 : index
    %18 = vector.load %arg6[%c0_12, %c0_13] : memref<8x128xbf16, #tpu.memory_space<vmem>>, vector<8x128xbf16>
    %c0_14 = arith.constant 0 : index
    %19 = memref.load %arg7[%c0_14] : memref<1xf32, #tpu.memory_space<smem>>
    %cst_15 = arith.constant dense<0.000000e+00> : vector<8x128xf32>
    %20 = tpu.matmul %18, %17, %cst_15 {dimension_numbers = #tpu.dot_dimension_numbers<[1], [1], [0], [0], [0, 0, 1, 0], [], []>} : vector<8x128xbf16>, vector<128x128xbf16>, vector<8x128xf32> -> vector<8x128xf32>
    %21 = vector.extract_strided_slice %20 {offsets = [0, 0], sizes = [1, 128], strides = [1, 1]} : vector<8x128xf32> to vector<1x128xf32>
    %22 = vector.broadcast %19 : f32 to vector<1x128xf32>
    %23 = arith.addf %21, %22 : vector<1x128xf32>
    %24 = arith.negf %23 : vector<1x128xf32>
    %25 = math.exp %24 : vector<1x128xf32>
    %cst_16 = arith.constant 1.000000e+00 : f32
    %26 = vector.broadcast %cst_16 : f32 to vector<1x128xf32>
    %27 = arith.addf %26, %25 : vector<1x128xf32>
    %28 = arith.divf %26, %27 : vector<1x128xf32>
    %c0_17 = arith.constant 0 : index
    %c0_18 = arith.constant 0 : index
    %29 = vector.load %arg8[%c0_17, %c0_18] : memref<1x128xf32, #tpu.memory_space<vmem>>, vector<1x128xf32>
    tpu.vector_store %arg8[%c0_17, %c0_18], %28 {strides = array<i32>} : memref<1x128xf32, #tpu.memory_space<vmem>>, vector<1x128xf32>,
    return
  }
  func.func @transform_0(%arg0: i32) -> (i32, i32) {
    %c0_i32 = arith.constant 0 : i32
    %c0_i32_0 = arith.constant 0 : i32
    return %arg0, %c0_i32 : i32, i32
  }
  func.func @transform_1(%arg0: i32) -> (i32, i32) {
    %c0_i32 = arith.constant 0 : i32
    %c0_i32_0 = arith.constant 0 : i32
    %c0_i32_1 = arith.constant 0 : i32
    return %c0_i32, %c0_i32_0 : i32, i32
  }
  func.func @transform_2(%arg0: i32) -> (i32, i32) {
    %c0_i32 = arith.constant 0 : i32
    %c0_i32_0 = arith.constant 0 : i32
    %c0_i32_1 = arith.constant 0 : i32
    return %c0_i32, %c0_i32_0 : i32, i32
  }
  func.func @transform_3(%arg0: i32) -> (i32, i32) {
    %c0_i32 = arith.constant 0 : i32
    %c0_i32_0 = arith.constant 0 : i32
    %c0_i32_1 = arith.constant 0 : i32
    return %c0_i32, %c0_i32_0 : i32, i32
  }
  func.func @transform_4(%arg0: i32) -> (i32, i32) {
    %c0_i32 = arith.constant 0 : i32
    %c0_i32_0 = arith.constant 0 : i32
    %c0_i32_1 = arith.constant 0 : i32
    return %c0_i32, %c0_i32_0 : i32, i32
  }
  func.func @transform_5(%arg0: i32) -> (i32, i32) {
    %c0_i32 = arith.constant 0 : i32
    %c0_i32_0 = arith.constant 0 : i32
    %c0_i32_1 = arith.constant 0 : i32
    return %c0_i32, %c0_i32_0 : i32, i32
  }
  func.func @transform_6(%arg0: i32) -> i32 {
    %c0_i32 = arith.constant 0 : i32
    %c0_i32_0 = arith.constant 0 : i32
    return %c0_i32 : i32
  }
  func.func @transform_7(%arg0: i32) -> (i32, i32) {
    %c0_i32 = arith.constant 0 : i32
    %c0_i32_0 = arith.constant 0 : i32
    return %c0_i32, %arg0 : i32, i32
  }
}

</mosaic_0001>

<bundles_post_ra>
// kernel: tpu_custom_call.1
= control target key start
LH: loop header
LB: loop body
LE: loop exit
PB: predicated region body
PF: predicated region fallthrough
CT: control target
= control target key end

     0   :  { %vm76_vm0 = vcmask 261120   ;;  %s799_s0 = inlined_call_operand.vmem [shape: f32[128,32], index: 0, kind: input, shape index: {}]   ;;  %s800_s1 = inlined_call_operand.vmem [shape: bf16[32,128], index: 1, kind: input, shape index: {}]   ;;  %s801_s2 = inlined_call_operand.vmem [shape: f32[1,128], index: 2, kind: input, shape index: {}]   ;;  %s802_s3 = inlined_call_operand.vmem [shape: bf16[128,128], index: 3, kind: input, shape index: {}]   ;;  %s803_s4 = inlined_call_operand.vmem [shape: f32[1,128], index: 4, kind: input, shape index: {}]   ;;  %s804_s5 = inlined_call_operand.vmem [shape: bf16[8,128], index: 5, kind: input, shape index: {}]   ;;  %s805_s6 = inlined_call_operand.<no memory space> [shape: f32[1], index: 6, kind: input, shape index: {}]   ;;  %s806_s7 = inlined_call_operand.hbm [shape: f32[1,128], index: 7, kind: output, shape index: {}]  }
   0x1   :  { %v610_v0 = vld [vmem:[%s800_s1 + $0x8] sm:$0xff]   ;;  %v611_v1 = vld [vmem:[%s800_s1] sm:$0xff]   ;;  %v31_v5 = vld [vmem:[%s799_s0 + $0x10] sm:$0xff] }
   0x2   :  { %535 = vmatprep.subr.bf16.mxu1 %v610_v0  ;;  %v29_v2 = vld [vmem:[%s799_s0] sm:$0xff]  ;;  %v30_v3 = vld [vmem:[%s799_s0 + $0x8] sm:$0xff]  ;;  %v32_v6 = vld [vmem:[%s799_s0 + $0x18] sm:$0xff] }
   0x3   :  { %536 = vmatpush3.bf16.msra.mxu1 %v610_v0  ;;  %v45_v4 = vpack.c.bf16 %v30_v3, %v29_v2  ;;  %v33_v7 = vld [vmem:[%s799_s0 + $0x20] sm:$0xff]  ;;  %v34_v8 = vld [vmem:[%s799_s0 + $0x28] sm:$0xff]  ;;  %v46_v9 = vpack.c.bf16 %v32_v6, %v31_v5  ;;  %v612_v11 = vld [vmem:[%s802_s3 + $0x38] sm:$0xff]  }
   0x4   :  { %537 = vmatprep.subr.bf16.mxu1 %v611_v1  ;;  %v47_v10 = vpack.c.bf16 %v34_v8, %v33_v7  ;;  %v35_v12 = vld [vmem:[%s799_s0 + $0x30] sm:$0xff]  ;;  %v36_v13 = vld [vmem:[%s799_s0 + $0x38] sm:$0xff]  ;;  %v37_v15 = vld [vmem:[%s799_s0 + $0x40] sm:$0xff] }
   0x5   :  { %539 = vmatprep.mubr.msk.bf16.mxu1 %vm76_vm0, %v45_v4  ;;  %v613_v14 = vld [vmem:[%s802_s3 + $0x30] sm:$0xff]   ;;  %v38_v16 = vld [vmem:[%s799_s0 + $0x48] sm:$0xff]  ;;  %v48_v18 = vpack.c.bf16 %v36_v13, %v35_v12 }
   0x6   :  { %v614_v17 = vld [vmem:[%s802_s3 + $0x28] sm:$0xff]  }
   0x7   :  { %538 = vmatpush3.bf16.msra.mxu1 %v611_v1 }
   0x8   :  { %555 = vmatprep.subr.bf16.mxu1 %v612_v11 }
   0xa   :  { %540 = vmatmul.mubr.msk.bf16.vlgmr.msra.gmra.mxu1 %vm76_vm0, %v46_v9 }
   0xb   :  { %543 = vmatprep.mubr.msk.bf16.mxu1 %vm76_vm0, %v47_v10  ;;  %556 = vmatpush3.bf16.msra.mxu1 %v612_v11 }
   0xc   :  { %557 = vmatprep.subr.bf16.mxu1 %v613_v14 }
   0xd   :  { %13 = vsyncpa [#allocation4], 0  ;;  %v49_v19 = vpack.c.bf16 %v38_v16, %v37_v15  ;;  %v615_v20 = vld [vmem:[%s802_s3 + $0x20] sm:$0xff]   ;;  %v39_v21 = vld [vmem:[%s799_s0 + $0x50] sm:$0xff]  ;;  %vm647_vm1 = vmmov 0   ;;  %s648_s9 = smov [#allocation3]  }
   0xe   :  { %v40_v22 = vld [vmem:[%s799_s0 + $0x58] sm:$0xff]  ;;  %v41_v23 = vld [vmem:[%s799_s0 + $0x60] sm:$0xff]  ;;  %v42_v24 = vld [vmem:[%s799_s0 + $0x68] sm:$0xff]  ;;  %s471_s10 = sshll.u32 %s648_s9, 4  ;;  %s472_s10 = int_to_ptr.vmem [resolvable:$true] %s471_s10 }
   0xf   :  { %558 = vmatpush3.bf16.msra.mxu1 %v613_v14  ;;  %v616_v25 = vld [vmem:[%s802_s3 + $0x18] sm:$0xff]   ;;  %v50_v26 = vpack.c.bf16 %v40_v22, %v39_v21  ;;  %v51_v27 = vpack.c.bf16 %v42_v24, %v41_v23  ;;  %v43_v28 = vld [vmem:[%s799_s0 + $0x70] sm:$0xff]  ;;  %v618_v32 = vld [vmem:[%s802_s3 + $0x8] sm:$0xff]   ;;  %s628_s11 = scalar_lea.vmem %s472_s10, 32  ;;  %p629_p1 = scmp.lt.s32.totalorder %s472_s10, %s472_s10 }
  0x10   :  { %559 = vmatprep.subr.bf16.mxu1 %v614_v17  ;;  %v44_v29 = vld [vmem:[%s799_s0 + $0x78] sm:$0xff]  ;;  %v617_v31 = vld [vmem:[%s802_s3 + $0x10] sm:$0xff]   ;;  %v619_v33 = vld [vmem:[%s802_s3] sm:$0xff]  }
  0x11   :  { %v52_v30 = vpack.c.bf16 %v44_v29, %v43_v28  ;;  %v479_v36 = vld [vmem:[%s801_s2] ss:$0 sm:$0xff] }
  0x12   :  { %544 = vmatmul.mubr.msk.bf16.gmra.mxu1 %vm76_vm0, %v48_v18  ;;  %v490_v29 = vld [vmem:[%s803_s4] ss:$0 sm:$0xff] }
  0x13   :  { %547 = vmatprep.mubr.msk.bf16.mxu1 %vm76_vm0, %v49_v19  ;;  %560 = vmatpush3.bf16.msra.mxu1 %v614_v17 }
  0x14   :  { %561 = vmatprep.subr.bf16.mxu1 %v615_v20 }
  0x17   :  { %562 = vmatpush3.bf16.msra.mxu1 %v615_v20 }
  0x18   :  { %563 = vmatprep.subr.bf16.mxu1 %v616_v25 }
  0x1a   :  { %548 = vmatmul.mubr.msk.bf16.gmra.mxu1 %vm76_vm0, %v50_v26 }
  0x1b   :  { %551 = vmatprep.mubr.msk.bf16.mxu1 %vm76_vm0, %v51_v27  ;;  %564 = vmatpush3.bf16.msra.mxu1 %v616_v25  ;;  %v646_v27 = vmov 0.0  }
  0x1c   :  { %565 = vmatprep.subr.bf16.mxu1 %v617_v31  ;;  %587 = vmatprep.subr.bf16.mxu0 %v646_v27 }
  0x1d   :  { %603 = vmatprep.mubr.msk.bf16.mxu0 %vm647_vm1, %v646_v27 }
  0x1f   :  { %566 = vmatpush3.bf16.msra.mxu1 %v617_v31 }
  0x20   :  { %567 = vmatprep.subr.bf16.mxu1 %v618_v32 }
  0x22   :  { %552 = vmatmul.mubr.msk.bf16.gmra.mxu1 %vm76_vm0, %v52_v30 }
  0x23   :  { %568 = vmatpush3.bf16.msra.mxu1 %v618_v32 }
  0x24   :  { %569 = vmatprep.subr.bf16.mxu1 %v619_v33 }
  0x27   :  { %570 = vmatpush3.bf16.msra.mxu1 %v619_v33 }
  0xca   :  { %v541_v34 = vpop.f32.mrf.mxu1 }
  0xcb   :  { %v144_v40 = vadd.f32 %v541_v34, %v479_v36 }
  0xcc   :  { %v135_v35 = vpop.f32.mrf.mxu1 }
  0xcd   :  { %v136_v38 = vadd.f32 %v479_v36, %v135_v35  ;;  %v200_v47 = vmax.f32 %v144_v40, 0.0 }
  0xce   :  { %v542_v37 = vpop.f32.mrf.mxu1 }
  0xcf   :  { %v147_v39 = vadd.f32 %v542_v37, %v479_v36  ;;  %v198_v45 = vmax.f32 %v136_v38, 0.0 }
  0xd0   :  { %v138_v41 = vpop.f32.mrf.mxu1 }
  0xd1   :  { %v139_v42 = vadd.f32 %v479_v36, %v138_v41  ;;  %v201_v43 = vmax.f32 %v147_v39, 0.0 }
  0xd2   :  { %v545_v44 = vpop.f32.mrf.mxu1 }
  0xd3   :  { %v199_v46 = vmax.f32 %v139_v42, 0.0  ;;  %v215_v50 = vpack.c.bf16 %v201_v43, %v200_v47  ;;  %v160_v54 = vadd.f32 %v545_v44, %v479_v36 }
  0xd4   :  { %v151_v48 = vpop.f32.mrf.mxu1 }
  0xd5   :  { %v214_v49 = vpack.c.bf16 %v199_v46, %v198_v45  ;;  %v152_v52 = vadd.f32 %v479_v36, %v151_v48  ;;  %v204_v61 = vmax.f32 %v160_v54, 0.0 }
  0xd6   :  { %v546_v51 = vpop.f32.mrf.mxu1 }
  0xd7   :  { %v163_v53 = vadd.f32 %v546_v51, %v479_v36  ;;  %571 = vmatprep.mubr.bf16.mxu1 %v214_v49  ;;  %v202_v59 = vmax.f32 %v152_v52, 0.0 }
  0xd8   :  { %v154_v55 = vpop.f32.mrf.mxu1  ;;  %572 = vmatmul.mubr.bf16.vlgmr.msra.gmra.mxu1 %v215_v50 }
  0xd9   :  { %v155_v56 = vadd.f32 %v479_v36, %v154_v55  ;;  %v205_v57 = vmax.f32 %v163_v53, 0.0 }
  0xda   :  { %v549_v58 = vpop.f32.mrf.mxu1 }
  0xdb   :  { %v203_v60 = vmax.f32 %v155_v56, 0.0  ;;  %v217_v0 = vpack.c.bf16 %v205_v57, %v204_v61  ;;  %v176_v4 = vadd.f32 %v549_v58, %v479_v36 }
  0xdc   :  { %v167_v62 = vpop.f32.mrf.mxu1 }
  0xdd   :  { %v216_v63 = vpack.c.bf16 %v203_v60, %v202_v59  ;;  %v168_v2 = vadd.f32 %v479_v36, %v167_v62  ;;  %v208_v11 = vmax.f32 %v176_v4, 0.0 }
  0xde   :  { %v550_v1 = vpop.f32.mrf.mxu1 }
  0xdf   :  { %v179_v3 = vadd.f32 %v550_v1, %v479_v36  ;;  %575 = vmatprep.mubr.bf16.mxu1 %v216_v63  ;;  %v206_v9 = vmax.f32 %v168_v2, 0.0 }
  0xe0   :  { %v170_v5 = vpop.f32.mrf.mxu1  ;;  %576 = vmatmul.mubr.bf16.gmra.mxu1 %v217_v0 }
  0xe1   :  { %v171_v6 = vadd.f32 %v479_v36, %v170_v5  ;;  %v209_v7 = vmax.f32 %v179_v3, 0.0 }
  0xe2   :  { %v553_v8 = vpop.f32.mrf.mxu1 }
  0xe3   :  { %v207_v10 = vmax.f32 %v171_v6, 0.0  ;;  %v219_v14 = vpack.c.bf16 %v209_v7, %v208_v11  ;;  %v192_v18 = vadd.f32 %v553_v8, %v479_v36 }
  0xe4   :  { %v183_v12 = vpop.f32.mrf.mxu1 }
  0xe5   :  { %v218_v13 = vpack.c.bf16 %v207_v10, %v206_v9  ;;  %v184_v16 = vadd.f32 %v479_v36, %v183_v12  ;;  %v212_v24 = vmax.f32 %v192_v18, 0.0 }
  0xe6   :  { %v554_v15 = vpop.f32.mrf.mxu1 }
  0xe7   :  { %v195_v17 = vadd.f32 %v554_v15, %v479_v36  ;;  %579 = vmatprep.mubr.bf16.mxu1 %v218_v13  ;;  %v210_v22 = vmax.f32 %v184_v16, 0.0 }
  0xe8   :  { %v186_v19 = vpop.f32.mrf.mxu1  ;;  %580 = vmatmul.mubr.bf16.gmra.mxu1 %v219_v14 }
  0xe9   :  { %v187_v20 = vadd.f32 %v479_v36, %v186_v19  ;;  %v213_v21 = vmax.f32 %v195_v17, 0.0 }
  0xeb   :  { %v211_v23 = vmax.f32 %v187_v20, 0.0  ;;  %v221_v26 = vpack.c.bf16 %v213_v21, %v212_v24  ;;  %v414_v21 = vld [vmem:[%s804_s5] sm:$0xf]  ;;  %s624_s5 = scalar_lea.vmem %s472_s10, 16 }
  0xec   :  { %p625_p0 = scmp.ne.s32.totalorder %s472_s10, %s624_s5  ;;  %p630_p2 = scmp.lt.s32.totalorder %s628_s11, %s624_s5 }
  0xed   :  { %v220_v25 = vpack.c.bf16 %v211_v23, %v210_v22  ;;  %v456_v22 = vstv %s805_s6 }
  0xee   :  { %p631_p3 = por %p630_p2, %p629_p1 }
  0xef   :  { %583 = vmatprep.mubr.bf16.mxu1 %v220_v25 }
  0xf0   :  { %584 = vmatmul.mubr.bf16.gmra.mxu1 %v221_v26  ;;  %p632_p4 = pnand %p631_p3, %p625_p0 }
 0x198   :  { %v573_v28 = vpop.f32.mrf.mxu1 }
 0x199   :  { %v336_v31 = vadd.f32 %v573_v28, %v490_v29 }
 0x19a   :  { %v327_v30 = vpop.f32.mrf.mxu1 }
 0x19b   :  { %v328_v33 = vadd.f32 %v490_v29, %v327_v30  ;;  %v392_v36 = vmax.f32 %v336_v31, 0.0 }
 0x19c   :  { %v574_v32 = vpop.f32.mrf.mxu1 }
 0x19d   :  { %v339_v34 = vadd.f32 %v574_v32, %v490_v29  ;;  %v390_v40 = vmax.f32 %v328_v33, 0.0 }
 0x19e   :  { %v330_v35 = vpop.f32.mrf.mxu1 }
 0x19f   :  { %v393_v37 = vmax.f32 %v339_v34, 0.0  ;;  %v331_v38 = vadd.f32 %v490_v29, %v330_v35 }
 0x1a0   :  { %v577_v39 = vpop.f32.mrf.mxu1 }
 0x1a1   :  { %v407_v41 = vpack.c.bf16 %v393_v37, %v392_v36  ;;  %v391_v42 = vmax.f32 %v331_v38, 0.0  ;;  %v352_v12 = vadd.f32 %v577_v39, %v490_v29 }
 0x1a2   :  { %v343_v43 = vpop.f32.mrf.mxu1 }
 0x1a3   :  { %v406_v44 = vpack.c.bf16 %v391_v42, %v390_v40  ;;  %v396_v14 = vmax.f32 %v352_v12, 0.0  ;;  %v344_v17 = vadd.f32 %v490_v29, %v343_v43 }
 0x1a4   :  { %v578_v45 = vpop.f32.mrf.mxu1 }
 0x1a5   :  { %v355_v10 = vadd.f32 %v578_v45, %v490_v29  ;;  %v394_v19 = vmax.f32 %v344_v17, 0.0 }
 0x1a6   :  { %v346_v46 = vpop.f32.mrf.mxu1 }
 0x1a7   :  { %v397_v13 = vmax.f32 %v355_v10, 0.0  ;;  %v347_v16 = vadd.f32 %v490_v29, %v346_v46 }
 0x1a8   :  { %v581_v47 = vpop.f32.mrf.mxu1 }
 0x1a9   :  { %v368_v2 = vadd.f32 %v581_v47, %v490_v29  ;;  %v409_v15 = vpack.c.bf16 %v397_v13, %v396_v14  ;;  %v395_v18 = vmax.f32 %v347_v16, 0.0 }
 0x1aa   :  { %v359_v48 = vpop.f32.mrf.mxu1 }
 0x1ab   :  { %v400_v4 = vmax.f32 %v368_v2, 0.0  ;;  %v360_v7 = vadd.f32 %v490_v29, %v359_v48  ;;  %v408_v20 = vpack.c.bf16 %v395_v18, %v394_v19 }
 0x1ac   :  { %v582_v49 = vpop.f32.mrf.mxu1 }
 0x1ad   :  { %v371_v0 = vadd.f32 %v582_v49, %v490_v29  ;;  %v398_v9 = vmax.f32 %v360_v7, 0.0 }
 0x1ae   :  { %v362_v50 = vpop.f32.mrf.mxu1 }
 0x1af   :  { %v401_v3 = vmax.f32 %v371_v0, 0.0  ;;  %v363_v6 = vadd.f32 %v490_v29, %v362_v50 }
 0x1b0   :  { %v585_v51 = vpop.f32.mrf.mxu1 }
 0x1b1   :  { %v384_v53 = vadd.f32 %v585_v51, %v490_v29  ;;  %v411_v5 = vpack.c.bf16 %v401_v3, %v400_v4  ;;  %v399_v8 = vmax.f32 %v363_v6, 0.0 }
 0x1b2   :  { %v375_v52 = vpop.f32.mrf.mxu1 }
 0x1b3   :  { %v404_v57 = vmax.f32 %v384_v53, 0.0  ;;  %v376_v61 = vadd.f32 %v490_v29, %v375_v52  ;;  %v410_v11 = vpack.c.bf16 %v399_v8, %v398_v9 }
 0x1b4   :  { %v586_v54 = vpop.f32.mrf.mxu1 }
 0x1b5   :  { %v387_v55 = vadd.f32 %v586_v54, %v490_v29  ;;  %v402_v63 = vmax.f32 %v376_v61, 0.0 }
 0x1b6   :  { %v378_v56 = vpop.f32.mrf.mxu1 }
 0x1b7   :  { %v405_v58 = vmax.f32 %v387_v55, 0.0  ;;  %v379_v59 = vadd.f32 %v490_v29, %v378_v56 }
 0x1b9   :  { %v413_v60 = vpack.c.bf16 %v405_v58, %v404_v57  ;;  %v403_v62 = vmax.f32 %v379_v59, 0.0 }
 0x1bb   :  { %588 = vmatpush3.bf16.xpose.msra.mxu0 %v413_v60  ;;  %v412_v1 = vpack.c.bf16 %v403_v62, %v402_v63 }
 0x1bc   :  { %589 = vmatprep.subr.bf16.mxu0 %v646_v27 }
 0x1c3   :  { %590 = vmatpush3.bf16.xpose.msra.mxu0 %v412_v1 }
 0x1c4   :  { %591 = vmatprep.subr.bf16.mxu0 %v646_v27 }
 0x1cb   :  { %592 = vmatpush3.bf16.xpose.msra.mxu0 %v411_v5 }
 0x1cc   :  { %593 = vmatprep.subr.bf16.mxu0 %v646_v27 }
 0x1d3   :  { %594 = vmatpush3.bf16.xpose.msra.mxu0 %v410_v11 }
 0x1d4   :  { %595 = vmatprep.subr.bf16.mxu0 %v646_v27 }
 0x1db   :  { %596 = vmatpush3.bf16.xpose.msra.mxu0 %v409_v15 }
 0x1dc   :  { %597 = vmatprep.subr.bf16.mxu0 %v646_v27 }
 0x1e3   :  { %598 = vmatpush3.bf16.xpose.msra.mxu0 %v408_v20 }
 0x1e4   :  { %599 = vmatprep.subr.bf16.mxu0 %v646_v27 }
 0x1eb   :  { %600 = vmatpush3.bf16.xpose.msra.mxu0 %v407_v41 }
 0x1ec   :  { %601 = vmatprep.subr.bf16.mxu0 %v646_v27 }
 0x1f3   :  { %602 = vmatpush3.bf16.xpose.msra.mxu0 %v406_v44 }
 0x1fa   :  { %604 = vmatmul.mubr.bf16.vlgmr.msra.gmra.mxu0 %v414_v21 }
 0x2ba   :  { %v450_v23 = vpop.f32.mrf.mxu0 }
 0x2bb   :  { %v457_v24 = vadd.f32 %v456_v22, %v450_v23 }
 0x2bc   :  { %v605_v25 = vpop.f32.mrf.mxu0 }
 0x2bd   :  { %v499_v26 = vmul.f32 -1.442695, %v457_v24 }
 0x2be   :  { %v453_v28 = vpop.f32.mrf.mxu0 }
 0x2bf   :  { %620 = vpow2.f32 %v499_v26 }
 0x2c0   :  { %v606_v29 = vpop.f32.mrf.mxu0 }
 0x2cc   :  { %v621_v30 = vpop.eup %620 }
 0x2cd   :  { %v461_v31 = vadd.f32 1.0, %v621_v30 }
 0x2cf   :  { %622 = vrcp.f32 %v461_v31 }
 0x2dc   :  { %v623_v27 = vpop.eup %622 }
 0x2dd   :  { %464 = vst [vmem:[#allocation3] sm:$0x1] %v623_v27 }
 0x2de   :  { %635 = shalt.err (!%p632_p4)
}
 0x2df   :  { %474 = dma.vmem_to_hbm [thread:$0]  %s472_s10, 16, %s806_s7, [#allocation4]  }
 0x2e0   :  { %644 = dma.done.wait [#allocation4], 16  }
 0x2e1   :  { %645 = vsyncadd [#allocation4], 4294967280 }
 0x2e2   :  { %478 = vsyncpa [#allocation4], 1 }

</bundles_post_ra>
